<compile_context>
chip_gen: v6e
topology: v6e:2x2x1
jax: 0.10.0
libtpu: 0.0.40
codegen_flags: <defaults>
</compile_context>

<pallas_src>
import functools

import jax
import jax.numpy as jnp
from jax import lax
from jax.experimental import pallas as pl
from jax.experimental.pallas import tpu as pltpu

_LANES = 128
_SUBLANES = 8
_TARGET_TILE_ROWS = 4096   # (4096, 128) f32 = 2 MiB per input block


def _num_tensorcores() -> int:
    """Best-effort TensorCores-per-chip detection (2 on v7x, else 1)."""
    try:
        info = pltpu.get_tpu_info()
    except Exception:
        return 1
    for attr in ("num_tensorcores", "tensorcores_per_chip", "tensor_cores_per_chip"):
        n = getattr(info, attr, None)
        if n is None:
            continue
        try:
            n = int(n)
        except Exception:
            continue
        if n > 0:
            return min(n, 2)
    # Only v7x has 2 TensorCores per chip; fall back to a chip-version check.
    if "7" in str(getattr(info, "chip_version", "")):
        return 2
    return 1


def _rmse_partial_kernel(p_ref, t_ref, o_ref, *, tile_rows, n_tiles,
                         tiles_per_core, valid_in_last, multi_core):
    if multi_core:
        c = pl.program_id(0)          # core axis (CORE_PARALLEL)
        i = pl.program_id(1)          # sequential reduction axis
        tile_idx = c * tiles_per_core + i   # un-clamped logical tile id
    else:
        i = pl.program_id(0)
        tile_idx = i

    @pl.when(i == 0)
    def _init():
        o_ref[...] = jnp.zeros_like(o_ref)

    def _accum(mask_tail):
        p = jnp.exp(p_ref[...].astype(jnp.float32))
        t = jnp.exp(t_ref[...].astype(jnp.float32))
        d = p - t
        sq = d * d
        if mask_tail:
            # Intra-tile element ids stay < tile_rows*128 -> no int32 overflow.
            rid = lax.broadcasted_iota(jnp.int32, (tile_rows, _LANES), 0)
            cid = lax.broadcasted_iota(jnp.int32, (tile_rows, _LANES), 1)
            # Keep the select: exp() of unspecified tail VMEM may be inf/NaN
            # and must be discarded by select, never by multiply-by-zero.
            sq = jnp.where(rid * _LANES + cid < valid_in_last, sq, 0.0)
        # Lane-parallel accumulation: reduce only the sublane-tile axis.
        o_ref[...] += sq.reshape(tile_rows // _SUBLANES, _SUBLANES, _LANES).sum(axis=0)

    has_tail = valid_in_last < tile_rows * _LANES   # static Python bool

    if has_tail:
        is_last = tile_idx == n_tiles - 1
        if multi_core:
            interior = jnp.logical_and(tile_idx < n_tiles, jnp.logical_not(is_last))
        else:
            interior = jnp.logical_not(is_last)

        @pl.when(interior)
        def _interior():
            _accum(False)

        @pl.when(is_last)
        def _tail():
            _accum(True)
    else:
        if multi_core:
            @pl.when(tile_idx < n_tiles)   # skip clamped duplicate tiles
            def _real():
                _accum(False)
        else:
            _accum(False)


def rmse_loss(predictions: jax.Array, targets: jax.Array) -> jax.Array:
    """Exp-transformed RMSE matching RMSELoss.forward. Returns a f32 scalar."""
    assert predictions.shape == targets.shape, "shapes must match (MSELoss semantics)"
    total_n = int(predictions.size)

    p_flat = predictions.reshape(-1)
    t_flat = targets.reshape(-1)

    # Lane-align only if strictly necessary (this path copies the inputs once).
    rem = total_n % _LANES
    if rem:
        pad = _LANES - rem
        p_flat = jnp.pad(p_flat, (0, pad))
        t_flat = jnp.pad(t_flat, (0, pad))
    n_rows = p_flat.shape[0] // _LANES
    p2d = p_flat.reshape(n_rows, _LANES)
    t2d = t_flat.reshape(n_rows, _LANES)

    rows_rounded = ((n_rows + _SUBLANES - 1) // _SUBLANES) * _SUBLANES
    tile_rows = min(_TARGET_TILE_ROWS, rows_rounded)
    n_tiles = -(-n_rows // tile_rows)
    # Valid elements inside the last logical tile (static Python int).
    valid_in_last = total_n - (n_tiles - 1) * tile_rows * _LANES

    ncores = _num_tensorcores() if n_tiles > 1 else 1
    ncores = max(1, min(ncores, n_tiles))
    multi_core = ncores > 1
    tiles_per_core = -(-n_tiles // ncores)

    kernel = functools.partial(
        _rmse_partial_kernel,
        tile_rows=tile_rows, n_tiles=n_tiles, tiles_per_core=tiles_per_core,
        valid_in_last=valid_in_last, multi_core=multi_core)

    if multi_core:
        def in_map(c, i):
            # Clamp so a finished core re-reads a valid block; the kernel skips
            # its work using the un-clamped tile_idx.
            return (jnp.minimum(c * tiles_per_core + i, n_tiles - 1), 0)

        grid = (ncores, tiles_per_core)
        in_specs = [pl.BlockSpec((tile_rows, _LANES), in_map),
                    pl.BlockSpec((tile_rows, _LANES), in_map)]
        out_specs = pl.BlockSpec((_SUBLANES, _LANES), lambda c, i: (c, 0))
        semantics = (getattr(pltpu, "CORE_PARALLEL", "parallel"),
                     getattr(pltpu, "ARBITRARY", "arbitrary"))
    else:
        grid = (n_tiles,)
        in_specs = [pl.BlockSpec((tile_rows, _LANES), lambda i: (i, 0)),
                    pl.BlockSpec((tile_rows, _LANES), lambda i: (i, 0))]
        out_specs = pl.BlockSpec((_SUBLANES, _LANES), lambda i: (0, 0))
        semantics = ("arbitrary",)

    cost = pl.CostEstimate(
        flops=3 * total_n,
        transcendentals=2 * total_n,
        bytes_accessed=2 * p2d.size * p2d.dtype.itemsize
                       + ncores * _SUBLANES * _LANES * 4)

    partials = pl.pallas_call(
        kernel,
        out_shape=jax.ShapeDtypeStruct((ncores * _SUBLANES, _LANES), jnp.float32),
        grid_spec=pltpu.PrefetchScalarGridSpec(
            num_scalar_prefetch=0,
            grid=grid,
            in_specs=in_specs,
            out_specs=out_specs,
        ),
        compiler_params=pltpu.CompilerParams(
            dimension_semantics=semantics,
            vmem_limit_bytes=32 << 20,
        ),
        cost_estimate=cost,
    )(p2d, t2d)

    # Tiny scalar epilogue: combine per-core lane partials, mean, sqrt.
    return jnp.sqrt(jnp.sum(partials) / jnp.float32(total_n))


def _reference(predictions, targets):
    p = jnp.exp(predictions.astype(jnp.float32))
    t = jnp.exp(targets.astype(jnp.float32))
    return jnp.sqrt(jnp.mean((p - t) ** 2))


if __name__ == "__main__":
    key = jax.random.PRNGKey(0)
    k1, k2 = jax.random.split(key)
    # Small NCHW-shaped "log-scale" inputs, as the module's docstring implies.
    shape = (2, 4, 16, 16)
    predictions = jax.random.normal(k1, shape, dtype=jnp.float32) * 0.5
    targets = jax.random.normal(k2, shape, dtype=jnp.float32) * 0.5

    loss = jax.block_until_ready(rmse_loss(predictions, targets))
    ref = jax.block_until_ready(_reference(predictions, targets))

    assert jnp.allclose(loss, ref, rtol=1e-5, atol=1e-5), (loss, ref)
    print("KERNEL_OK")
</pallas_src>

<mosaic_0001>
module attributes {stable_mosaic.version = 11 : i64} {
  func.func @_rmse_partial_kernel(%arg0: i32, %arg1: memref<16x128xf32, #tpu.memory_space<vmem>>, %arg2: memref<16x128xf32, #tpu.memory_space<vmem>>, %arg3: memref<8x128xf32, #tpu.memory_space<vmem>>) attributes {dimension_semantics = [#tpu.dimension_semantics<arbitrary>], iteration_bounds = array<i64: 1>, scalar_prefetch = 0 : i64, scratch_operands = 0 : i64, tpu.core_type = #tpu.core_type<tc>, window_params = [{transform_indices = @transform_0, window_bounds = array<i64: 16, 128>}, {transform_indices = @transform_1, window_bounds = array<i64: 16, 128>}, {pipeline_mode = #tpu.pipeline_mode<synchronous>, transform_indices = @transform_2, window_bounds = array<i64: 8, 128>}]} {
    %c0_i32 = arith.constant 0 : i32
    %0 = arith.cmpi eq, %arg0, %c0_i32 : i32
    %1 = arith.extui %0 : i1 to i32
    %c0_i32_0 = arith.constant 0 : i32
    %2 = arith.cmpi ne, %1, %c0_i32_0 : i32
    scf.if %2 {
      %cst_8 = arith.constant 0.000000e+00 : f32
      %14 = vector.broadcast %cst_8 : f32 to vector<8x128xf32>
      %c0_9 = arith.constant 0 : index
      %c0_10 = arith.constant 0 : index
      %15 = vector.load %arg3[%c0_9, %c0_10] : memref<8x128xf32, #tpu.memory_space<vmem>>, vector<8x128xf32>
      tpu.vector_store %arg3[%c0_9, %c0_10], %14 {strides = array<i32>} : memref<8x128xf32, #tpu.memory_space<vmem>>, vector<8x128xf32>,
    } else {
    }
    %c0 = arith.constant 0 : index
    %c0_1 = arith.constant 0 : index
    %3 = vector.load %arg1[%c0, %c0_1] : memref<16x128xf32, #tpu.memory_space<vmem>>, vector<16x128xf32>
    %4 = math.exp %3 : vector<16x128xf32>
    %c0_2 = arith.constant 0 : index
    %c0_3 = arith.constant 0 : index
    %5 = vector.load %arg2[%c0_2, %c0_3] : memref<16x128xf32, #tpu.memory_space<vmem>>, vector<16x128xf32>
    %6 = math.exp %5 : vector<16x128xf32>
    %7 = arith.subf %4, %6 : vector<16x128xf32>
    %8 = arith.mulf %7, %7 : vector<16x128xf32>
    %c0_4 = arith.constant 0 : index
    %c0_5 = arith.constant 0 : index
    %9 = vector.load %arg3[%c0_4, %c0_5] : memref<8x128xf32, #tpu.memory_space<vmem>>, vector<8x128xf32>
    %10 = vector.shape_cast %8 : vector<16x128xf32> to vector<2x8x128xf32>
    %cst = arith.constant dense<0.000000e+00> : vector<8x128xf32>
    %11 = vector.multi_reduction <add>, %10, %cst [0] : vector<2x8x128xf32> to vector<8x128xf32>
    %12 = arith.addf %9, %11 : vector<8x128xf32>
    %c0_6 = arith.constant 0 : index
    %c0_7 = arith.constant 0 : index
    %13 = vector.load %arg3[%c0_6, %c0_7] : memref<8x128xf32, #tpu.memory_space<vmem>>, vector<8x128xf32>
    tpu.vector_store %arg3[%c0_6, %c0_7], %12 {strides = array<i32>} : memref<8x128xf32, #tpu.memory_space<vmem>>, vector<8x128xf32>,
    return
  }
  func.func @transform_0(%arg0: i32) -> (i32, i32) {
    %c0_i32 = arith.constant 0 : i32
    %c0_i32_0 = arith.constant 0 : i32
    return %arg0, %c0_i32 : i32, i32
  }
  func.func @transform_1(%arg0: i32) -> (i32, i32) {
    %c0_i32 = arith.constant 0 : i32
    %c0_i32_0 = arith.constant 0 : i32
    return %arg0, %c0_i32 : i32, i32
  }
  func.func @transform_2(%arg0: i32) -> (i32, i32) {
    %c0_i32 = arith.constant 0 : i32
    %c0_i32_0 = arith.constant 0 : i32
    %c0_i32_1 = arith.constant 0 : i32
    return %c0_i32, %c0_i32_0 : i32, i32
  }
}

</mosaic_0001>

<bundles_post_ra>
// kernel: tpu_custom_call.1
= control target key start
LH: loop header
LB: loop body
LE: loop exit
PB: predicated region body
PF: predicated region fallthrough
CT: control target
= control target key end

     0   :  { %7 = vsyncpa [#allocation3], 0  ;;  %s190_s0 = inlined_call_operand.hbm [shape: f32[16,128], index: 0, kind: input, shape index: {}]   ;;  %s191_s1 = inlined_call_operand.hbm [shape: f32[16,128], index: 1, kind: input, shape index: {}]   ;;  %s192_s2 = inlined_call_operand.hbm [shape: f32[8,128], index: 2, kind: output, shape index: {}]  }
   0x1   :  { %8 = vsyncpa [#allocation6], 0 }
   0x2   :  { %9 = vsyncpa [#allocation4], 0  ;;  %s161_s9 = smov [#allocation2]  }
   0x3   :  { %s15_s10 = sshll.u32 %s161_s9, 4  ;;  %s16_s10 = int_to_ptr.vmem [resolvable:$true] %s15_s10 }
   0x4   :  { %s103_s11 = scalar_lea.vmem %s16_s10, 256  ;;  %p108_p1 = scmp.lt.s32.totalorder %s16_s10, %s16_s10 }
   0x5   :  { %p104_p0 = scmp.ne.s32.totalorder %s16_s10, %s103_s11  ;;  %p109_p2 = scmp.lt.s32.totalorder %s103_s11, %s103_s11 }
   0x7   :  { %p110_p3 = por %p109_p2, %p108_p1 }
   0x9   :  { %p111_p4 = pnand %p110_p3, %p104_p0 }
   0xb   :  { %114 = shalt.err (!%p111_p4)
}
   0xc   :  { %s162_s12 = smov 128   ;;  %s163_s13 = smov 8  }
   0xd   :  { %21 = dma.hbm_to_vmem [thread:$0]  %s190_s0, 256, %s16_s10, [#allocation3], %s162_s12, %s162_s12, %s163_s13  }
   0xe   :  { %s164_s16 = smov [#allocation5]  }
   0xf   :  { %s27_s17 = sshll.u32 %s164_s16, 4  ;;  %s28_s17 = int_to_ptr.vmem [resolvable:$true] %s27_s17 }
  0x10   :  { %s123_s18 = scalar_lea.vmem %s28_s17, 256  ;;  %p128_p6 = scmp.lt.s32.totalorder %s28_s17, %s28_s17 }
  0x11   :  { %p124_p5 = scmp.ne.s32.totalorder %s28_s17, %s123_s18  ;;  %p129_p7 = scmp.lt.s32.totalorder %s123_s18, %s123_s18 }
  0x13   :  { %p130_p8 = por %p129_p7, %p128_p6 }
  0x15   :  { %p131_p9 = pnand %p130_p8, %p124_p5 }
  0x17   :  { %134 = shalt.err (!%p131_p9)
}
  0x18   :  { %33 = dma.hbm_to_vmem [thread:$0]  %s191_s1, 256, %s28_s17, [#allocation6], %s162_s12, %s162_s12, %s163_s13  }
  0x19   :  { %155 = dma.done.wait [#allocation3], 256  }
  0x1a   :  { %156 = vsyncadd [#allocation3], 4294967040 }
  0x1b   :  { %157 = dma.done.wait [#allocation6], 256  }
  0x1c   :  { %158 = vsyncadd [#allocation6], 4294967040  ;;  %v45_v0 = vld [vmem:[#allocation2] sm:$0xff]  ;;  %v46_v1 = vld [vmem:[#allocation2 + $0x8] sm:$0xff]  ;;  %s165_s0 = smov [#allocation7]  }
  0x1d   :  { %v51_v2 = vld [vmem:[#allocation5] sm:$0xff]  ;;  %v47_v3 = vmul.f32 1.442695, %v45_v0  ;;  %v49_v4 = vmul.f32 1.442695, %v46_v1  ;;  %v52_v5 = vld [vmem:[#allocation5 + $0x8] sm:$0xff] }
  0x1e   :  { %v53_v6 = vmul.f32 1.442695, %v51_v2  ;;  %v55_v7 = vmul.f32 1.442695, %v52_v5  ;;  %s71_s1 = sshll.u32 %s165_s0, 4  ;;  %s72_s1 = int_to_ptr.vmem [resolvable:$true] %s71_s1 }
  0x1f   :  { %87 = vpow2.f32 %v47_v3  ;;  %s135_s21 = scalar_lea.vmem %s72_s1, 128  ;;  %p140_p11 = scmp.lt.s32.totalorder %s72_s1, %s72_s1 }
  0x20   :  { %89 = vpow2.f32 %v49_v4  ;;  %p136_p10 = scmp.ne.s32.totalorder %s72_s1, %s135_s21  ;;  %p141_p12 = scmp.lt.s32.totalorder %s135_s21, %s135_s21 }
  0x21   :  { %91 = vpow2.f32 %v53_v6 }
  0x22   :  { %93 = vpow2.f32 %v55_v7  ;;  %p142_p13 = por %p141_p12, %p140_p11 }
  0x24   :  { %p143_p0 = pnand %p142_p13, %p136_p10 }
  0x2c   :  { %v88_v8 = vpop.eup %87 }
  0x2d   :  { %v90_v9 = vpop.eup %89 }
  0x2e   :  { %v92_v10 = vpop.eup %91 }
  0x2f   :  { %v94_v11 = vpop.eup %93  ;;  %v57_v12 = vsub.f32 %v88_v8, %v92_v10 }
  0x30   :  { %v58_v13 = vsub.f32 %v90_v9, %v94_v11 }
  0x31   :  { %v59_v14 = vmul.f32 %v57_v12, %v57_v12 }
  0x32   :  { %v60_v15 = vmul.f32 %v58_v13, %v58_v13 }
  0x34   :  { %v62_v16 = vadd.f32 %v60_v15, %v59_v14 }
  0x36   :  { %64 = vst [vmem:[#allocation7] sm:$0xff] %v62_v16 }
  0x37   :  { %146 = shalt.err (!%p143_p0)
}
  0x38   :  { %74 = dma.vmem_to_hbm [thread:$0]  %s72_s1, 128, %s192_s2, [#allocation4]  }
  0x39   :  { %159 = dma.done.wait [#allocation4], 128  }
  0x3a   :  { %160 = vsyncadd [#allocation4], 4294967168 }
  0x3b   :  { %78 = vsyncpa [#allocation3], 1 }
  0x3c   :  { %79 = vsyncpa [#allocation6], 1 }
  0x3d   :  { %80 = vsyncpa [#allocation4], 1 }

</bundles_post_ra>
